<compile_context>
chip_gen: v7x
topology: tpu7x:2x2x1
jax: 0.10.0
libtpu: 0.0.40
codegen_flags: <defaults>
</compile_context>

<pallas_src>
import functools

import jax
import jax.numpy as jnp
from jax.experimental import pallas as pl
from jax.experimental.pallas import tpu as pltpu

EPS = 1e-5  # nn.LayerNorm default

_MAX_ROW_TILE = 2048  # rows per grid step (multiple of 8)


def _vmem_limit_bytes():
    """Scoped-VMEM limit: ~75% of physical (128 MiB v5e/v6e, 64 MiB v7x)."""
    try:
        cap = pltpu.get_tpu_info().vmem_capacity_bytes
    except Exception:
        cap = 64 * 1024 * 1024  # conservative fallback (v7x per-core VMEM)
    return min(int(cap * 3 // 4), 100 * 1024 * 1024)


_VMEM_LIMIT_BYTES = _vmem_limit_bytes()
_VMEM_TILE_BUDGET = int(_VMEM_LIMIT_BYTES * 0.8)  # headroom under the limit


@functools.lru_cache(maxsize=None)
def _single_buffer_ok():
    """Probe whether BlockSpec(pipeline_mode=pl.Buffered(1)) is supported
    (used to keep constant-index operands single-buffered and save VMEM)."""
    try:
        spec = pl.BlockSpec((8, 128), lambda i: (0, 0),
                            pipeline_mode=pl.Buffered(1))

        def _copy(x_ref, o_ref):
            o_ref[...] = x_ref[...]

        x = jnp.zeros((8, 128), jnp.float32)
        out = pl.pallas_call(
            _copy,
            out_shape=jax.ShapeDtypeStruct((8, 128), jnp.float32),
            grid=(1,),
            in_specs=[spec],
            out_specs=pl.BlockSpec((8, 128), lambda i: (0, 0)),
        )(x)
        jax.block_until_ready(out)
        return True
    except Exception:
        return False


def _resident_spec(block_shape, index_map):
    """Spec for operands whose block index never changes: no double buffer."""
    if _single_buffer_ok():
        return pl.BlockSpec(block_shape, index_map,
                            pipeline_mode=pl.Buffered(1))
    return pl.BlockSpec(block_shape, index_map)


def _normalize(x_f32, gamma_f32, beta_f32):
    """Two-pass LayerNorm (PyTorch-parity numerics).  LN is HBM-bound, so the
    extra VALU pass is hidden; rsqrt goes to the EUP slot (free vs. VALU)."""
    dim = x_f32.shape[-1]
    mean = jnp.sum(x_f32, axis=-1, keepdims=True) * (1.0 / dim)
    xc = x_f32 - mean
    var = jnp.sum(xc * xc, axis=-1, keepdims=True) * (1.0 / dim)
    inv = jax.lax.rsqrt(var + EPS)
    return xc * inv * gamma_f32 + beta_f32


def _ln_kernel(x_ref, gamma_ref, beta_ref, o_ref):
    # x_ref: (TR, dim); gamma/beta: (1, dim).
    x = x_ref[...].astype(jnp.float32)
    g = gamma_ref[...].astype(jnp.float32)
    b = beta_ref[...].astype(jnp.float32)
    o_ref[...] = _normalize(x, g, b).astype(o_ref.dtype)


def _ln_linear_kernel(x_ref, gamma_ref, beta_ref, w_ref, b_ref, o_ref):
    # Fused LayerNorm + Linear epilogue.  The normalized tile stays in
    # VMEM/vregs and feeds the MXU in the weights' native dtype.
    x = x_ref[...].astype(jnp.float32)
    g = gamma_ref[...].astype(jnp.float32)
    bt = beta_ref[...].astype(jnp.float32)
    y = _normalize(x, g, bt)
    w = w_ref[...]                                   # NO f32 cast of W
    o = jnp.dot(y.astype(w.dtype), w, preferred_element_type=jnp.float32)
    o = o + b_ref[...].astype(jnp.float32)
    o_ref[...] = o.astype(o_ref.dtype)


def _choose_row_tile(rows, bytes_per_row, resident_bytes=0):
    """Largest row tile whose real per-step working set (double-buffered I/O
    tiles + in-kernel f32 temporaries) fits the VMEM budget, clamped so the
    grid has >= 2 steps (keeps both v7x TensorCores busy)."""
    if rows <= 8:
        return rows  # one block == full row extent (allowed by tiling rule)
    budget = max(_VMEM_TILE_BUDGET - resident_bytes, 2 * 1024 * 1024)
    tr = budget // max(int(bytes_per_row), 1)
    rows_aligned = pl.cdiv(rows, 8) * 8
    tr = max(8, min(_MAX_ROW_TILE, rows_aligned, (tr // 8) * 8))
    half = max(8, ((rows_aligned // 2 + 7) // 8) * 8)
    return min(tr, half)


def layer_norm_pallas(x, gamma, beta, out_dtype=None):
    """LayerNorm over the last axis of x (any leading shape). No padding:
    grid = cdiv(rows, tr), ragged last block handled by the pipeline."""
    orig_shape = x.shape
    dim = orig_shape[-1]
    rows = x.size // dim
    out_dtype = jnp.dtype(out_dtype or x.dtype)
    in_item = jnp.dtype(x.dtype).itemsize

    x2 = x.reshape(rows, dim)
    # 2x input + 2x output tiles (double-buffered) + f32 temporaries (x, y).
    per_row = 2 * dim * in_item + 2 * dim * out_dtype.itemsize + 2 * dim * 4
    tr = _choose_row_tile(rows, per_row)
    grid = (pl.cdiv(rows, tr),)

    cost = pl.CostEstimate(
        flops=8 * rows * dim,
        transcendentals=rows,
        bytes_accessed=int(rows * dim * (in_item + out_dtype.itemsize)
                           + 2 * dim * 4))

    out = pl.pallas_call(
        _ln_kernel,
        out_shape=jax.ShapeDtypeStruct((rows, dim), out_dtype),
        grid_spec=pltpu.PrefetchScalarGridSpec(
            num_scalar_prefetch=0,
            grid=grid,
            in_specs=[
                pl.BlockSpec((tr, dim), lambda i: (i, 0)),       # row tiles
                _resident_spec((1, dim), lambda i: (0, 0)),      # gamma
                _resident_spec((1, dim), lambda i: (0, 0)),      # beta
            ],
            out_specs=pl.BlockSpec((tr, dim), lambda i: (i, 0)),
        ),
        compiler_params=pltpu.CompilerParams(
            dimension_semantics=("parallel",),
            vmem_limit_bytes=_VMEM_LIMIT_BYTES),
        cost_estimate=cost,
    )(x2, gamma.reshape(1, dim), beta.reshape(1, dim))
    return out.reshape(orig_shape)


def layer_norm_linear_pallas(x, gamma, beta, w, b, out_dtype=None):
    """Fused LayerNorm + Linear(dim -> dim_out) in one kernel."""
    orig_shape = x.shape
    dim = orig_shape[-1]
    dim_out = w.shape[-1]
    rows = x.size // dim
    out_dtype = jnp.dtype(out_dtype or x.dtype)
    in_item = jnp.dtype(x.dtype).itemsize
    w_item = jnp.dtype(w.dtype).itemsize

    x2 = x.reshape(rows, dim)

    # N-tiling of W (needed when W + buffers would overrun VMEM, e.g. v7x).
    w_budget = _VMEM_TILE_BUDGET // 2
    if dim * dim_out * w_item * 2 <= w_budget or dim_out <= 256:
        tn = dim_out                      # W fully VMEM-resident
    else:
        cols = w_budget // (dim * w_item * 2)
        tn = max(256, (cols // 256) * 256)   # multiple of 256 fills the MXU
        tn = min(tn, dim_out)
    n_steps = pl.cdiv(dim_out, tn)

    resident = dim * tn * w_item * 2 + tn * 4
    per_row = (2 * dim * in_item + 2 * tn * out_dtype.itemsize
               + (2 * dim + tn) * 4)
    tr = _choose_row_tile(rows, per_row, resident_bytes=resident)
    grid = (n_steps, pl.cdiv(rows, tr))   # rows innermost: W tile stays put

    if n_steps == 1:  # W / bias block index never changes -> single-buffer
        w_spec = _resident_spec((dim, tn), lambda j, i: (0, j))
        b_spec = _resident_spec((1, tn), lambda j, i: (0, j))
    else:
        w_spec = pl.BlockSpec((dim, tn), lambda j, i: (0, j))
        b_spec = pl.BlockSpec((1, tn), lambda j, i: (0, j))

    cost = pl.CostEstimate(
        flops=8 * rows * dim * n_steps + 2 * rows * dim * dim_out,
        transcendentals=rows * n_steps,
        bytes_accessed=int(rows * dim * in_item * n_steps
                           + rows * dim_out * out_dtype.itemsize
                           + dim * dim_out * w_item
                           + (2 * dim + dim_out) * 4))

    out = pl.pallas_call(
        _ln_linear_kernel,
        out_shape=jax.ShapeDtypeStruct((rows, dim_out), out_dtype),
        grid_spec=pltpu.PrefetchScalarGridSpec(
            num_scalar_prefetch=0,
            grid=grid,
            in_specs=[
                pl.BlockSpec((tr, dim), lambda j, i: (i, 0)),    # row tiles
                _resident_spec((1, dim), lambda j, i: (0, 0)),   # gamma
                _resident_spec((1, dim), lambda j, i: (0, 0)),   # beta
                w_spec,                                          # weights
                b_spec,                                          # bias
            ],
            out_specs=pl.BlockSpec((tr, tn), lambda j, i: (i, j)),
        ),
        compiler_params=pltpu.CompilerParams(
            dimension_semantics=("parallel", "parallel"),
            vmem_limit_bytes=_VMEM_LIMIT_BYTES),
        cost_estimate=cost,
    )(x2, gamma.reshape(1, dim), beta.reshape(1, dim), w, b.reshape(1, dim_out))
    return out.reshape(orig_shape[:-1] + (dim_out,))


def layer_normalize(x, gamma, beta, fn=None, fn_params=None,
                    norm_out_dtype=None, **kwargs):
    """Equivalent of LayerNormalize.forward: fn(LayerNorm(x), **kwargs).

    If fn is a Linear, pass fn_params=(w, b) for the fully fused kernel.
    For the generic path, norm_out_dtype=jnp.bfloat16 halves HBM writeback
    when the downstream fn tolerates bf16.
    """
    if fn_params is not None:
        w, b = fn_params
        return layer_norm_linear_pallas(x, gamma, beta, w, b)
    # TODO(synk): arbitrary user-supplied `fn` sub-modules run in plain JAX;
    # only the Linear case is fused into the Pallas kernel.
    y = layer_norm_pallas(x, gamma, beta, out_dtype=norm_out_dtype)
    return fn(y, **kwargs)


if __name__ == "__main__":
    # Small demo shapes; dim is lane-dense (multiple of 128).
    batch, seq, dim = 2, 8, 128

    key = jax.random.PRNGKey(0)
    kx, kw, kb = jax.random.split(key, 3)

    x = jax.random.normal(kx, (batch, seq, dim), dtype=jnp.float32)

    # nn.LayerNorm(dim) parameters: elementwise affine, init gamma=1, beta=0.
    gamma = jnp.ones((dim,), dtype=jnp.float32)
    beta = jnp.zeros((dim,), dtype=jnp.float32)

    # The wrapped `fn`: Linear(dim -> dim).
    w = jax.random.normal(kw, (dim, dim), dtype=jnp.float32) * (1.0 / dim ** 0.5)
    b = jax.random.normal(kb, (dim,), dtype=jnp.float32) * 0.01
    fn = lambda y: jnp.dot(y, w) + b

    # Fused path (LayerNorm + Linear in one kernel).
    out_fused = layer_normalize(x, gamma, beta, fn_params=(w, b))
    jax.block_until_ready(out_fused)

    # Generic path (LayerNorm kernel, fn in plain JAX).
    out_generic = layer_normalize(x, gamma, beta, fn=fn)
    jax.block_until_ready(out_generic)

    # Pure-JAX reference.
    mean = jnp.mean(x, axis=-1, keepdims=True)
    var = jnp.mean((x - mean) ** 2, axis=-1, keepdims=True)
    y_ref = (x - mean) / jnp.sqrt(var + EPS) * gamma + beta
    ref = fn(y_ref)

    assert jnp.allclose(out_fused, ref, atol=1e-4, rtol=1e-4), "fused mismatch"
    assert jnp.allclose(out_generic, ref, atol=1e-4, rtol=1e-4), "generic mismatch"

    # bf16 projection weights: fused epilogue runs a native bf16 MXU GEMM
    # (no in-kernel f32 cast of W); looser tolerance for bf16 rounding.
    out_bf16 = layer_normalize(
        x, gamma, beta,
        fn_params=(w.astype(jnp.bfloat16), b.astype(jnp.bfloat16)))
    jax.block_until_ready(out_bf16)
    assert jnp.allclose(out_bf16, ref, atol=5e-2, rtol=5e-2), "bf16 fused mismatch"

    print("KERNEL_OK")
</pallas_src>

<mosaic_0001>
module attributes {stable_mosaic.version = 11 : i64} {
  func.func @_copy(%arg0: i32, %arg1: memref<8x128xf32, #tpu.memory_space<vmem>>, %arg2: memref<8x128xf32, #tpu.memory_space<vmem>>) attributes {dimension_semantics = [#tpu.dimension_semantics<arbitrary>], iteration_bounds = array<i64: 1>, scalar_prefetch = 0 : i64, scratch_operands = 0 : i64, tpu.core_type = #tpu.core_type<tc>, window_params = [{pipeline_mode = #tpu.pipeline_mode<synchronous>, transform_indices = @transform_0, window_bounds = array<i64: 8, 128>}, {pipeline_mode = #tpu.pipeline_mode<synchronous>, transform_indices = @transform_1, window_bounds = array<i64: 8, 128>}]} {
    %c0 = arith.constant 0 : index
    %c0_0 = arith.constant 0 : index
    %0 = vector.load %arg1[%c0, %c0_0] : memref<8x128xf32, #tpu.memory_space<vmem>>, vector<8x128xf32>
    %c0_1 = arith.constant 0 : index
    %c0_2 = arith.constant 0 : index
    %1 = vector.load %arg2[%c0_1, %c0_2] : memref<8x128xf32, #tpu.memory_space<vmem>>, vector<8x128xf32>
    tpu.vector_store %arg2[%c0_1, %c0_2], %0 {strides = array<i32>} : memref<8x128xf32, #tpu.memory_space<vmem>>, vector<8x128xf32>,
    return
  }
  func.func @transform_0(%arg0: i32) -> (i32, i32) {
    %c0_i32 = arith.constant 0 : i32
    %c0_i32_0 = arith.constant 0 : i32
    %c0_i32_1 = arith.constant 0 : i32
    return %c0_i32, %c0_i32_0 : i32, i32
  }
  func.func @transform_1(%arg0: i32) -> (i32, i32) {
    %c0_i32 = arith.constant 0 : i32
    %c0_i32_0 = arith.constant 0 : i32
    %c0_i32_1 = arith.constant 0 : i32
    return %c0_i32, %c0_i32_0 : i32, i32
  }
}

module attributes {stable_mosaic.version = 11 : i64} {
  func.func @_ln_linear_kernel(%arg0: i32, %arg1: i32, %arg2: memref<8x128xf32, #tpu.memory_space<vmem>>, %arg3: memref<1x128xf32, #tpu.memory_space<vmem>>, %arg4: memref<1x128xf32, #tpu.memory_space<vmem>>, %arg5: memref<128x128xf32, #tpu.memory_space<vmem>>, %arg6: memref<1x128xf32, #tpu.memory_space<vmem>>, %arg7: memref<8x128xf32, #tpu.memory_space<vmem>>) attributes {dimension_semantics = [#tpu.dimension_semantics<parallel>, #tpu.dimension_semantics<parallel>], iteration_bounds = array<i64: 1, 2>, scalar_prefetch = 0 : i64, scratch_operands = 0 : i64, tpu.core_type = #tpu.core_type<tc>, window_params = [{transform_indices = @transform_0, window_bounds = array<i64: 8, 128>}, {pipeline_mode = #tpu.pipeline_mode<synchronous>, transform_indices = @transform_1, window_bounds = array<i64: 1, 128>}, {pipeline_mode = #tpu.pipeline_mode<synchronous>, transform_indices = @transform_2, window_bounds = array<i64: 1, 128>}, {transform_indices = @transform_3, window_bounds = array<i64: 128, 128>}, {transform_indices = @transform_4, window_bounds = array<i64: 1, 128>}, {transform_indices = @transform_5, window_bounds = array<i64: 8, 128>}]} {
    %c0 = arith.constant 0 : index
    %c0_0 = arith.constant 0 : index
    %0 = vector.load %arg2[%c0, %c0_0] : memref<8x128xf32, #tpu.memory_space<vmem>>, vector<8x128xf32>
    %c0_1 = arith.constant 0 : index
    %c0_2 = arith.constant 0 : index
    %1 = vector.load %arg3[%c0_1, %c0_2] : memref<1x128xf32, #tpu.memory_space<vmem>>, vector<1x128xf32>
    %c0_3 = arith.constant 0 : index
    %c0_4 = arith.constant 0 : index
    %2 = vector.load %arg4[%c0_3, %c0_4] : memref<1x128xf32, #tpu.memory_space<vmem>>, vector<1x128xf32>
    %cst = arith.constant dense<0.000000e+00> : vector<8xf32>
    %3 = vector.multi_reduction <add>, %0, %cst [1] : vector<8x128xf32> to vector<8xf32>
    %4 = vector.shape_cast %3 : vector<8xf32> to vector<8x1xf32>
    %cst_5 = arith.constant 7.812500e-03 : f32
    %5 = vector.broadcast %cst_5 : f32 to vector<8x1xf32>
    %6 = arith.mulf %4, %5 : vector<8x1xf32>
    %7 = vector.broadcast %6 : vector<8x1xf32> to vector<8x128xf32>
    %8 = arith.subf %0, %7 : vector<8x128xf32>
    %9 = arith.mulf %8, %8 : vector<8x128xf32>
    %cst_6 = arith.constant dense<0.000000e+00> : vector<8xf32>
    %10 = vector.multi_reduction <add>, %9, %cst_6 [1] : vector<8x128xf32> to vector<8xf32>
    %11 = vector.shape_cast %10 : vector<8xf32> to vector<8x1xf32>
    %cst_7 = arith.constant 7.812500e-03 : f32
    %12 = vector.broadcast %cst_7 : f32 to vector<8x1xf32>
    %13 = arith.mulf %11, %12 : vector<8x1xf32>
    %cst_8 = arith.constant 9.99999974E-6 : f32
    %14 = vector.broadcast %cst_8 : f32 to vector<8x1xf32>
    %15 = arith.addf %13, %14 : vector<8x1xf32>
    %16 = math.rsqrt %15 : vector<8x1xf32>
    %17 = vector.broadcast %16 : vector<8x1xf32> to vector<8x128xf32>
    %18 = arith.mulf %8, %17 : vector<8x128xf32>
    %19 = vector.broadcast %1 : vector<1x128xf32> to vector<8x128xf32>
    %20 = arith.mulf %18, %19 : vector<8x128xf32>
    %21 = vector.broadcast %2 : vector<1x128xf32> to vector<8x128xf32>
    %22 = arith.addf %20, %21 : vector<8x128xf32>
    %c0_9 = arith.constant 0 : index
    %c0_10 = arith.constant 0 : index
    %23 = vector.load %arg5[%c0_9, %c0_10] : memref<128x128xf32, #tpu.memory_space<vmem>>, vector<128x128xf32>
    %cst_11 = arith.constant dense<0.000000e+00> : vector<8x128xf32>
    %24 = tpu.matmul %22, %23, %cst_11 {dimension_numbers = #tpu.dot_dimension_numbers<[1], [0], [0], [1], [0, 0, 1, 1], [], []>} : vector<8x128xf32>, vector<128x128xf32>, vector<8x128xf32> -> vector<8x128xf32>
    %c0_12 = arith.constant 0 : index
    %c0_13 = arith.constant 0 : index
    %25 = vector.load %arg6[%c0_12, %c0_13] : memref<1x128xf32, #tpu.memory_space<vmem>>, vector<1x128xf32>
    %26 = vector.broadcast %25 : vector<1x128xf32> to vector<8x128xf32>
    %27 = arith.addf %24, %26 : vector<8x128xf32>
    %c0_14 = arith.constant 0 : index
    %c0_15 = arith.constant 0 : index
    %28 = vector.load %arg7[%c0_14, %c0_15] : memref<8x128xf32, #tpu.memory_space<vmem>>, vector<8x128xf32>
    tpu.vector_store %arg7[%c0_14, %c0_15], %27 {strides = array<i32>} : memref<8x128xf32, #tpu.memory_space<vmem>>, vector<8x128xf32>,
    return
  }
  func.func @transform_0(%arg0: i32, %arg1: i32) -> (i32, i32) {
    %c0_i32 = arith.constant 0 : i32
    %c0_i32_0 = arith.constant 0 : i32
    return %arg1, %c0_i32 : i32, i32
  }
  func.func @transform_1(%arg0: i32, %arg1: i32) -> (i32, i32) {
    %c0_i32 = arith.constant 0 : i32
    %c0_i32_0 = arith.constant 0 : i32
    %c0_i32_1 = arith.constant 0 : i32
    return %c0_i32, %c0_i32_0 : i32, i32
  }
  func.func @transform_2(%arg0: i32, %arg1: i32) -> (i32, i32) {
    %c0_i32 = arith.constant 0 : i32
    %c0_i32_0 = arith.constant 0 : i32
    %c0_i32_1 = arith.constant 0 : i32
    return %c0_i32, %c0_i32_0 : i32, i32
  }
  func.func @transform_3(%arg0: i32, %arg1: i32) -> (i32, i32) {
    %c0_i32 = arith.constant 0 : i32
    %c0_i32_0 = arith.constant 0 : i32
    return %c0_i32, %arg0 : i32, i32
  }
  func.func @transform_4(%arg0: i32, %arg1: i32) -> (i32, i32) {
    %c0_i32 = arith.constant 0 : i32
    %c0_i32_0 = arith.constant 0 : i32
    return %c0_i32, %arg0 : i32, i32
  }
  func.func @transform_5(%arg0: i32, %arg1: i32) -> (i32, i32) {
    %c0_i32 = arith.constant 0 : i32
    return %arg1, %arg0 : i32, i32
  }
}

</mosaic_0001>

<bundles_post_ra>
// kernel: tpu_custom_call.1
= control target key start
LH: loop header
LB: loop body
LE: loop exit
PB: predicated region body
PF: predicated region fallthrough
CT: control target
= control target key end

     0   :  { %6 = vsyncpa [#allocation3], 0  ;;  %s124_s0 = inlined_call_operand.hbm [shape: f32[8,128], index: 0, kind: input, shape index: {}]   ;;  %s125_s1 = inlined_call_operand.hbm [shape: f32[8,128], index: 1, kind: output, shape index: {}]  }
   0x1   :  { %7 = vsyncpa [#allocation4], 0  ;;  %s88_s6 = smov [#allocation2]   ;;  %s40_s10 = scalar_lea.hbm %s124_s0, 128 }
   0x2   :  { %s14_s7 = sshll.u32 %s88_s6, 4  ;;  %p41_p0 = scmp.ne.s32.totalorder %s124_s0, %s40_s10  ;;  %s15_s7 = int_to_ptr.vmem [resolvable:$true] %s14_s7 }
   0x3   :  { %p44_p1 = scmp.lt.u32.totalorder %s40_s10, %s124_s0 }
   0x5   :  { %p46_p2 = pnand %p44_p1, %p41_p0 }
   0x7   :  { %49 = shalt.err (!%p46_p2)
}
   0x8   :  { %s50_s15 = scalar_lea.vmem %s15_s7, 128  ;;  %p55_p4 = scmp.lt.s32.totalorder %s15_s7, %s15_s7 }
   0x9   :  { %p51_p3 = scmp.ne.s32.totalorder %s15_s7, %s50_s15  ;;  %p56_p5 = scmp.lt.s32.totalorder %s50_s15, %s50_s15 }
   0xb   :  { %p57_p6 = por %p56_p5, %p55_p4 }
   0xd   :  { %p58_p7 = pnand %p57_p6, %p51_p3 }
   0xf   :  { %61 = shalt.err (!%p58_p7)
}
  0x10   :  { %17 = dma.hbm_to_vmem [thread:$0]  %s124_s0, 128, %s15_s7, [#allocation3]  }
  0x11   :  { %84 = dma.done.wait [#allocation3], 128  }
  0x12   :  { %85 = vsyncadd [#allocation3], 4294967168  ;;  %s89_s18 = smov [#allocation5]   ;;  %v21_v0 = vld [vmem:[#allocation2] sm:$0xff] }
  0x13   :  { %s29_s19 = sshll.u32 %s89_s18, 4  ;;  %22 = vst [vmem:[#allocation5] sm:$0xff] %v21_v0  ;;  %s30_s19 = int_to_ptr.vmem [resolvable:$true] %s29_s19 }
  0x14   :  { %s62_s20 = scalar_lea.vmem %s30_s19, 128  ;;  %p67_p9 = scmp.lt.s32.totalorder %s30_s19, %s30_s19 }
  0x15   :  { %p63_p8 = scmp.ne.s32.totalorder %s30_s19, %s62_s20  ;;  %p68_p10 = scmp.lt.s32.totalorder %s62_s20, %s62_s20 }
  0x17   :  { %p69_p11 = por %p68_p10, %p67_p9 }
  0x19   :  { %p70_p12 = pnand %p69_p11, %p63_p8 }
  0x1b   :  { %73 = shalt.err (!%p70_p12)
}
  0x1c   :  { %s74_s23 = scalar_lea.hbm %s125_s1, 128 }
  0x1d   :  { %p75_p13 = scmp.ne.s32.totalorder %s125_s1, %s74_s23  ;;  %p78_p0 = scmp.lt.u32.totalorder %s74_s23, %s125_s1 }
  0x1f   :  { %p80_p1 = pnand %p78_p0, %p75_p13 }
  0x21   :  { %83 = shalt.err (!%p80_p1)
}
  0x22   :  { %32 = dma.vmem_to_hbm [thread:$0]  %s30_s19, 128, %s125_s1, [#allocation4]  }
  0x23   :  { %86 = dma.done.wait [#allocation4], 128  }
  0x24   :  { %87 = vsyncadd [#allocation4], 4294967168 }
  0x25   :  { %36 = vsyncpa [#allocation3], 1 }
  0x26   :  { %37 = vsyncpa [#allocation4], 1 }

// kernel: tpu_custom_call.1
= control target key start
LH: loop header
LB: loop body
LE: loop exit
PB: predicated region body
PF: predicated region fallthrough
CT: control target
= control target key end

     0   :  { %10 = vsyncpa [#allocation3], 0  ;;  %s1116_s0 = inlined_call_operand.hbm [shape: f32[16,128], index: 0, kind: input, shape index: {}]   ;;  %s1117_s1 = inlined_call_operand.vmem [shape: f32[1,128], index: 1, kind: input, shape index: {}]   ;;  %s1118_s2 = inlined_call_operand.vmem [shape: f32[1,128], index: 2, kind: input, shape index: {}]   ;;  %s1119_s3 = inlined_call_operand.hbm [shape: f32[128,128], index: 3, kind: input, shape index: {}]   ;;  %s1120_s4 = inlined_call_operand.vmem [shape: f32[1,128], index: 4, kind: input, shape index: {}]   ;;  %s1121_s5 = inlined_call_operand.hbm [shape: f32[16,128], index: 5, kind: output, shape index: {}]  }
   0x1   :  { %12 = vsyncpa [#allocation3 + $0x1], 0 }
   0x2   :  { %13 = vsyncpa [#allocation6], 0 }
   0x3   :  { %14 = vsyncpa [#allocation4], 0 }
   0x4   :  { %16 = vsyncpa [#allocation4 + $0x1], 0  ;;  %s889_s18 = smov 0   ;;  %s891_s19 = smov 0  }
   0x5   :  { %s893_s20 = smov 0   ;;  %s895_s21 = smov 0  }
   0x6   :  { %s897_s22 = smov 0   ;;  %s899_s23 = smov 0  }
   0x7 LB: > { %s530_s24 = sadd.s32 4294967295, %s849_s23   ;;  %s531_s25 = sadd.s32 4294967294, %s849_s23   ;;  %s849_s23 = sphi %s899_s23, %s22_s23   ;;  %s845_s22 = sphi %s897_s22, %s1145_s22   ;;  %s841_s21 = sphi %s895_s21, %s1144_s21   ;;  %s837_s20 = sphi %s893_s20, %s1143_s20   ;;  %s833_s19 = sphi %s891_s19, %s1142_s19   ;;  %s829_s18 = sphi %s889_s18, %s1141_s18  }
   0x8   : > { %p54_p0 = scmp.ne.s32.totalorder %s833_s19, %s829_s18  ;;  %p923_p1 = scmp.eq.s32.totalorder %s530_s24, 0 }
   0x9   : > { %p927_p2 = scmp.eq.s32.totalorder %s530_s24, 1  ;;  %p180_p3 = scmp.eq.s32.totalorder %s531_s25, 1 }
   0xa   : > { %s1126_s26 = scalar_select %p923_p1, 1, 0 }
   0xb   : > { %s1127_s27 = scalar_select %p927_p2, 1, 0 }
   0xc   : > { %p933_p4 = por %p923_p1, %p54_p0  ;;  %p532_p5 = scmp.ge.s32.totalorder %s849_s23, 1 }
   0xd   : > { %p938_p6 = por %p180_p3, %p54_p0  ;;  %p187_p7 = scmp.lt.s32.totalorder %s849_s23, 3 }
   0xe   : > { %s1128_s28 = scalar_select %p933_p4, 1, 0 }
   0xf   : > { %s1129_s29 = scalar_select %p938_p6, 1, 0 }
  0x10   : > { %p943_p8 = pnand %p532_p5, %p187_p7  ;;  %s851_s6 = smov [#allocation5]  }
  0x11   : > { %s207_s7 = sshll.u32 %s851_s6, 4  ;;  %s31_s9 = sadd.s32 1, %s845_s22  ;;  %s208_s7 = int_to_ptr.vmem [resolvable:$true] %s207_s7 }
  0x12   : > { %s1130_s30 = scalar_select %p943_p8, 1, 0 }
  0x13   : > { %p633_p9 = pneg %p943_p8  ;;  %s705_s12 = scalar_lea.hbm %s1119_s3, 2048 }
  0x14   : > { %p706_p12 = scmp.ne.s32.totalorder %s1119_s3, %s705_s12  ;;  %p712_p5 = scmp.lt.u32.totalorder %s705_s12, %s1119_s3 }
  0x15   : > { %p952_p11 = pnand %p633_p9, %p923_p1 }
  0x17   : > { %p707_p13 = pneg %p952_p11 }
  0x19   : > { %p708_p0 = pnand %p707_p13, %p706_p12 }
  0x1b   : > { %p709_p3 = pneg %p708_p0 }
  0x1d   : > { %p714_p7 = pnand %p712_p5, %p709_p3 }
  0x1f   : > { %717 = shalt.err (!%p714_p7)
}
  0x20   : > { %s718_s17 = scalar_lea.vmem %s208_s7, 2048  ;;  %p726_p1 = scmp.lt.s32.totalorder %s208_s7, %s208_s7 }
  0x21   : > { %p719_p9 = scmp.ne.s32.totalorder %s208_s7, %s718_s17  ;;  %p727_p4 = scmp.lt.s32.totalorder %s718_s17, %s718_s17 }
  0x23   : > { %p721_p10 = pnand %p719_p9, %p707_p13  ;;  %p728_p8 = por %p727_p4, %p726_p1 }
  0x25   : > { %p722_p6 = pneg %p721_p10 }
  0x27   : > { %p729_p2 = pnand %p728_p8, %p722_p6 }
  0x29   : > { %732 = shalt.err (!%p729_p2)
}
  0x2a   : > { %s852_s24 = smov 128   ;;  %s853_s25 = smov 8  }
  0x2b   : > { %636 = dma.hbm_to_vmem [thread:$0]  (!%p952_p11), %s1119_s3, 2048, %s208_s7, [#allocation6], %s852_s24, %s852_s24, %s853_s25  }
  0x2c   : > { %p32_p1 = scmp.ge.s32.totalorder %s31_s9, 2  ;;  %s41_s11 = sadd.s32 1, %s837_s20 }
  0x2d   : > { %p48_p2 = scmp.ne.s32.totalorder %s837_s20, %s833_s19  ;;  %p49_p4 = scmp.eq.s32.totalorder %s849_s23, 0 }
  0x2e   : > { %s1147_s9 = smov (%p32_p1, %s31_s9), 0  ;;  %p1133_p8 = scmp.ne.s32.totalorder %s1127_s27, 0 }
  0x2f   : > { %p979_p6 = por %p49_p4, %p48_p2  ;;  %s38_s8 = ssub.s32 %s845_s22, %s1147_s9 }
  0x30   : > { %p985_p10 = por %p1133_p8, %p48_p2  ;;  %p646_p12 = scmp.lt.s32.totalorder %s849_s23, 2 }
  0x31   : > { %p39_p11 = scmp.eq.s32.totalorder %s38_s8, 0  ;;  %s227_s7 = sand.u32 1, %s837_s20  }
  0x32   : > { %s536_s14 = sshll.u32 %s227_s7, 3  ;;  %s537_s16 = sshll.u32 %s845_s22, 7 }
  0x33   : > { %s994_s15 = scalar_select %p39_p11, %s837_s20, %s41_s11  }
  0x34   : > { %s1000_s25 = scalar_lea.hbm %s1116_s0, %s537_s16  ;;  %s231_s27 = scalar_lea.vmem [#allocation2], %s536_s14 }
  0x35   : > { %s238_s6 = sshll.u32 %s231_s27, 4  ;;  %p1006_p13 = pnand %p646_p12, %p979_p6  ;;  %s1002_s6 = int_to_ptr.vmem [resolvable:$true] %s238_s6 }
  0x36   : > { %s228_s11 = scalar_lea.sflag [#allocation3], %s227_s7  ;;  %s733_s8 = scalar_lea.hbm %s1000_s25, 128 }
  0x37   : > { %p734_p0 = scmp.ne.s32.totalorder %s1000_s25, %s733_s8  ;;  %p735_p3 = pneg %p1006_p13 }
  0x38   : > { %s738_s17 = scalar_lea.hbm %s1116_s0, 256  ;;  %p739_p9 = scmp.lt.u32.totalorder %s1000_s25, %s1116_s0 }
  0x39   : > { %p736_p5 = pnand %p735_p3, %p734_p0  ;;  %p740_p1 = scmp.lt.u32.totalorder %s738_s17, %s733_s8 }
  0x3a   : > { %p742_p4 = scmp.lt.u32.totalorder %s733_s8, %s1000_s25 }
  0x3b   : > { %p737_p7 = pneg %p736_p5  ;;  %p741_p2 = por %p740_p1, %p739_p9 }
  0x3d   : > { %p743_p6 = por %p742_p4, %p741_p2 }
  0x3f   : > { %p744_p8 = pnand %p743_p6, %p737_p7 }
  0x41   : > { %747 = shalt.err (!%p744_p8)
}
  0x42   : > { %s748_s7 = scalar_lea.vmem %s1002_s6, 128  ;;  %s854_s27 = smov [#allocation2]  }
  0x43   : > { %p749_p12 = scmp.ne.s32.totalorder %s1002_s6, %s748_s7  ;;  %s753_s14 = sshll.u32 %s854_s27, 4  ;;  %s754_s14 = int_to_ptr.vmem [resolvable:$false] %s753_s14 }
  0x44   : > { %s755_s16 = scalar_lea.vmem %s754_s14, 256  ;;  %p756_p5 = scmp.lt.s32.totalorder %s1002_s6, %s754_s14 }
  0x45   : > { %p751_p11 = pnand %p749_p12, %p735_p3  ;;  %p757_p9 = scmp.lt.s32.totalorder %s755_s16, %s748_s7 }
  0x47   : > { %p752_p0 = pneg %p751_p11  ;;  %p758_p1 = por %p757_p9, %p756_p5 }
  0x49   : > { %p759_p2 = pnand %p758_p1, %p752_p0 }
  0x4b   : > { %762 = shalt.err (!%p759_p2)
}
  0x4c   : > { %640 = dma.hbm_to_vmem [thread:$0]  (!%p1006_p13), %s1000_s25, 128, %s1002_s6, %s228_s11  }
  0x4d   : > { %p1136_p7 = scmp.ne.s32.totalorder %s1130_s30, 0 }
  0x4e   : > { %s1038_s8 = sand.u32 (!%p1136_p7), 1, %s833_s19   ;;  %p1137_p3 = scmp.ne.s32.totalorder (!%p1136_p7), %s1128_s28, 0 }
  0x4f   : > { %247 = sbr.rel (%p1136_p7) target bundleno = 630 (0x276), region = 40  ;;  %s539_s17 = sshll.u32 (!%p1136_p7), %s1038_s8, 3 }
  0x50   : > { %s250_s12 = scalar_lea.sflag (!%p1136_p7), [#allocation3], %s1038_s8  ;;  %s253_s24 = scalar_lea.vmem (!%p1136_p7), [#allocation2], %s539_s17 }
  0x56   : > { %816 = dma.done.wait (%p1137_p3), %s250_s12, 128  }
  0x57   : > { %818 = vsyncadd (%p1137_p3), %s250_s12, 4294967168  ;;  %p1138_p13 = scmp.ne.s32.totalorder %s1126_s26, 0 }
  0x59   : > { %820 = dma.done.wait (%p1138_p13), [#allocation6], 2048  }
  0x5a   : > { %822 = vsyncadd (%p1138_p13), [#allocation6], 4294965248  ;;  %v290_v0 = vld [vmem:[%s253_s24] sm:$0xff]  ;;  %v318_v1 = vld [vmem:[#allocation5] sm:$0xff]  ;;  %v855_v4 = vmov 0.0|0.0   ;;  %vm856_vm0 = vmmov 0  }
  0x5b   : > { %293 = vadd.xlane.f32.xlu0 %v290_v0  ;;  %v319_v2 = vld [vmem:[#allocation5 + $0x8] sm:$0xff]  ;;  %v320_v3 = vld [vmem:[#allocation5 + $0x10] sm:$0xff]  ;;  %601 = vmatprep.subr.bf16.mxu0 %v855_v4  ;;  %v321_v6 = vld [vmem:[#allocation5 + $0x18] sm:$0xff]  ;;  %v857_v23 = vmov 0.0   ;;  %s546_s11 = sshll.u32 %s841_s21, 7  ;;  %s286_s7 = scalar_lea.vmem [#allocation7], %s539_s17 }
  0x5c   : > { %v602_v5 = vpack.c.bf16 %v319_v2, %v318_v1  ;;  %v605_v7 = vpack.c.bf16 %v321_v6, %v320_v3  ;;  %v322_v8 = vld [vmem:[#allocation5 + $0x20] sm:$0xff]  ;;  %v323_v9 = vld [vmem:[#allocation5 + $0x28] sm:$0xff]  ;;  %v324_v15 = vld [vmem:[#allocation5 + $0x30] sm:$0xff]  ;;  %598 = vmatprep.mubr.msk.f32.mxu0 %vm856_vm0, %v857_v23  ;;  %s427_s27 = sshll.u32 %s286_s7, 4  ;;  %s1067_s12 = scalar_lea.hbm %s1121_s5, %s546_s11  ;;  %s1069_s27 = int_to_ptr.vmem [resolvable:$true] %s427_s27 }
  0x5d   : > { %v608_v10 = vpack.c.bf16 %v323_v9, %v322_v8  ;;  %v325_v16 = vld [vmem:[#allocation5 + $0x38] sm:$0xff]  ;;  %v326_v18 = vld [vmem:[#allocation5 + $0x40] sm:$0xff]  ;;  %v327_v19 = vld [vmem:[#allocation5 + $0x48] sm:$0xff]  ;;  %s413_s24 = scalar_lea.sflag [#allocation4], %s1038_s8  ;;  %s763_s26 = scalar_lea.vmem %s1069_s27, 128 }
  0x5e   : > { %603 = vmatpush3.bf16.msra.mxu0 %v602_v5  ;;  %v611_v17 = vpack.c.bf16 %v325_v16, %v324_v15  ;;  %v614_v20 = vpack.c.bf16 %v327_v19, %v326_v18  ;;  %v328_v21 = vld [vmem:[#allocation5 + $0x50] sm:$0xff]  ;;  %v329_v22 = vld [vmem:[#allocation5 + $0x58] sm:$0xff]  ;;  %v330_v25 = vld [vmem:[#allocation5 + $0x60] sm:$0xff]  ;;  %p764_p4 = scmp.ne.s32.totalorder %s1069_s27, %s763_s26  ;;  %s858_s21 = smov [#allocation7]  }
  0x5f   : > { %604 = vmatprep.subr.bf16.mxu0 %v855_v4  ;;  %v617_v24 = vpack.c.bf16 %v329_v22, %v328_v21  ;;  %v331_v26 = vld [vmem:[#allocation5 + $0x68] sm:$0xff]  ;;  %v332_v28 = vld [vmem:[#allocation5 + $0x70] sm:$0xff]  ;;  %v333_v29 = vld [vmem:[#allocation5 + $0x78] sm:$0xff]  ;;  %s767_s17 = sshll.u32 %s858_s21, 4  ;;  %s768_s17 = int_to_ptr.vmem [resolvable:$false] %s767_s17 }
  0x60   : > { %v620_v27 = vpack.c.bf16 %v331_v26, %v330_v25  ;;  %v623_v30 = vpack.c.bf16 %v333_v29, %v332_v28  ;;  %v542_v35 = vld [vmem:[%s1117_s1] ss:$0 sm:$0xff]  ;;  %p765_p6 = pnand %p764_p4, %p985_p10  ;;  %s769_s28 = scalar_lea.vmem %s768_s17, 256 }
  0x61   : > { %v543_v37 = vld [vmem:[%s1118_s2] ss:$0 sm:$0xff]  ;;  %p770_p12 = scmp.lt.s32.totalorder %s1069_s27, %s768_s17  ;;  %p771_p11 = scmp.lt.s32.totalorder %s769_s28, %s763_s26 }
  0x62   : > { %606 = vmatpush3.bf16.msra.mxu0 %v605_v7  ;;  %v544_v40 = vld [vmem:[%s1120_s4] ss:$0 sm:$0xff]  ;;  %p766_p8 = pneg %p765_p6 }
  0x63   : > { %607 = vmatprep.subr.bf16.mxu0 %v855_v4  ;;  %p772_p0 = por %p771_p11, %p770_p12 }
  0x65   : > { %p773_p5 = pnand %p772_p0, %p766_p8 }
  0x66   : > { %609 = vmatpush3.bf16.msra.mxu0 %v608_v10 }
  0x67   : > { %610 = vmatprep.subr.bf16.mxu0 %v855_v4 }
  0x6a   : > { %612 = vmatpush3.bf16.msra.mxu0 %v611_v17 }
  0x6b   : > { %613 = vmatprep.subr.bf16.mxu0 %v855_v4 }
  0x6e   : > { %615 = vmatpush3.bf16.msra.mxu0 %v614_v20 }
  0x6f   : > { %616 = vmatprep.subr.bf16.mxu0 %v855_v4 }
  0x72   : > { %618 = vmatpush3.bf16.msra.mxu0 %v617_v24 }
  0x73   : > { %619 = vmatprep.subr.bf16.mxu0 %v855_v4 }
  0x76   : > { %621 = vmatpush3.bf16.msra.mxu0 %v620_v27 }
  0x77   : > { %622 = vmatprep.subr.bf16.mxu0 %v855_v4 }
  0x7a   : > { %624 = vmatpush3.bf16.msra.mxu0 %v623_v30 }
  0xe8   : > { %v294_v11 = vpop.xlane.xlu0 %293 }
  0xe9   : > { %v295_v12 = vmul.f32 0.0078125, %v294_v11 }
  0xeb   : > { %v296_v13 = vsub.f32 %v290_v0, %v295_v12 }
  0xed   : > { %v297_v14 = vmul.f32 %v296_v13, %v296_v13 }
  0xef   : > { %298 = vadd.xlane.f32.xlu0 %v297_v14 }
 0x17c   : > { %v299_v31 = vpop.xlane.xlu0 %298 }
 0x17d   : > { %v300_v32 = vmul.f32 0.0078125, %v299_v31 }
 0x17f   : > { %v301_v33 = vadd.f32 1e-05, %v300_v32 }
 0x181   : > { %703 = vrsqrt.f32 %v301_v33 }
 0x18b   : > { %v704_v34 = vpop.eup %703 }
 0x18c   : > { %v303_v36 = vmul.f32 %v704_v34, %v296_v13 }
 0x18e   : > { %v310_v38 = vmul.f32 %v542_v35, %v303_v36 }
 0x190   : > { %v317_v39 = vadd.f32 %v543_v37, %v310_v38 }
 0x192   : > { %599 = vmatmul.mubr.f32.vlgmr.msra.gmra.mrb[0].mxu0 %v317_v39 }
 0x265   : > { %v407_v41 = vpop.f32.mrb[0].mxu0 }
 0x266   : > { %v408_v42 = vadd.f32 %v544_v40, %v407_v41  ;;  %v600_v43 = vpop.f32.mrb[1].mxu0 }
 0x268   : > { %411 = vst [vmem:[%s286_s7] sm:$0xff] %v408_v42 }
 0x269   : > { %776 = shalt.err (!%p773_p5)
}
 0x26a   : > { %s777_s8 = scalar_lea.hbm %s1067_s12, 128  ;;  %s781_s6 = scalar_lea.hbm %s1121_s5, 256 }
 0x26b   : > { %p778_p9 = scmp.ne.s32.totalorder %s1067_s12, %s777_s8  ;;  %p782_p7 = scmp.lt.u32.totalorder %s1067_s12, %s1121_s5 }
 0x26c   : > { %p783_p3 = scmp.lt.u32.totalorder %s781_s6, %s777_s8  ;;  %p785_p4 = scmp.lt.u32.totalorder %s777_s8, %s1067_s12 }
 0x26d   : > { %p779_p1 = pnand %p778_p9, %p985_p10 }
 0x26e   : > { %p784_p13 = por %p783_p3, %p782_p7 }
 0x26f   : > { %p780_p2 = pneg %p779_p1 }
 0x270   : > { %p786_p6 = por %p785_p4, %p784_p13 }
 0x272   : > { %p787_p8 = pnand %p786_p6, %p780_p2 }
 0x274   : > { %790 = shalt.err (!%p787_p8)
}
 0x275   : > { %631 = dma.vmem_to_hbm [thread:$0]  (%p985_p10), %s1069_s27, 128, %s1067_s12, %s413_s24  }
 0x276 PF: > { %s439_s7 = sand.u32 1, %s829_s18   ;;  %p1139_p12 = scmp.ne.s32.totalorder %s1129_s29, 0 }
 0x277   : > { %p1140_p11 = scmp.ge.s32.totalorder %s849_s23, 2  ;;  %s440_s14 = scalar_lea.sflag [#allocation4], %s439_s7 }
 0x279   : > { %p642_p0 = pnand %p1140_p11, %p1139_p12 }
 0x27b   : > { %824 = dma.done.wait (!%p642_p0), %s440_s14, 128  }
 0x27c   : > { %826 = vsyncadd (!%p642_p0), %s440_s14, 4294967168  ;;  %s22_s23 = sadd.s32 1, %s849_s23   ;;  %s1141_s18 = smov %s833_s19 }
 0x27d   : > { %p19_p5 = scmp.ge.s32.totalorder %s22_s23, 4   ;;  %s1142_s19 = smov %s837_s20 }
 0x27e   : > { %s1143_s20 = smov %s994_s15  ;;  %s1144_s21 = smov %s845_s22 }
 0x27f   : > { %s1145_s22 = smov %s1147_s9  ;;  %21 = sbr.rel (!%p19_p5) target bundleno = 7 (0x7), region = 93 }
 0x286   :  { %445 = vsyncpa [#allocation3], 1 }
 0x287   :  { %447 = vsyncpa [#allocation3 + $0x1], 1 }
 0x288   :  { %448 = vsyncpa [#allocation6], 1 }
 0x289   :  { %449 = vsyncpa [#allocation4], 1 }
 0x28a   :  { %451 = vsyncpa [#allocation4 + $0x1], 1 }

</bundles_post_ra>
